<compile_context>
chip_gen: v6e
topology: v6e:2x2x1
jax: 0.10.0
libtpu: 0.0.40
codegen_flags: <defaults>
</compile_context>

<pallas_src>
import math
from functools import partial

import jax
import jax.numpy as jnp
from jax import lax
from jax.experimental import pallas as pl
from jax.experimental.pallas import tpu as pltpu


def _cdiv(a, b):
    return (a + b - 1) // b


def _round_up(v, m):
    return ((v + m - 1) // m) * m


def _balanced_tile(dim, cap, align):
    """Largest balanced tile <= cap (reviewer formula).  Returns (tile, padded_dim)."""
    dim_r = _round_up(max(dim, 1), align)
    cap = max(align, min(_round_up(cap, align), dim_r))
    steps = _cdiv(dim_r, cap)
    tile = _round_up(_cdiv(dim_r, steps), align)
    return tile, tile * steps


def _min_pad_tile(dim, cap, align):
    """Tile <= cap minimizing the padded extent (ties -> biggest tile).  Used for K."""
    dim_r = _round_up(max(dim, 1), align)
    cap = max(align, min(_round_up(cap, align), dim_r))
    best_t, best_pad = cap, cap * _cdiv(dim_r, cap)
    t = cap - align
    while t >= align:
        pad = t * _cdiv(dim_r, t)
        if pad < best_pad:
            best_t, best_pad = t, pad
        t -= align
    return best_t, best_pad


def _affine_kernel_accum_out(x_ref, w_ref, b_ref, o_ref):
    """f32-output path: accumulate directly into the resident output block."""
    k = pl.program_id(2)

    # Fold bias into the accumulator init (no epilogue add / copy needed).
    @pl.when(k == 0)
    def _():
        o_ref[...] = jnp.broadcast_to(b_ref[...], o_ref.shape)

    # Contract feat_dim (dim 1 of both operands) -> (tm, tn). Transposed-B form
    # is consumed natively by the MXU; weight keeps its (out_dim, feat_dim) layout.
    o_ref[...] += lax.dot_general(
        x_ref[...], w_ref[...],
        dimension_numbers=(((1,), (1,)), ((), ())),
        preferred_element_type=jnp.float32,
    )


def _affine_kernel_scratch(x_ref, w_ref, b_ref, o_ref, acc_ref):
    """Low-precision-output path: f32 scratch accumulator, cast in epilogue."""
    k = pl.program_id(2)

    @pl.when(k == 0)
    def _():
        acc_ref[...] = jnp.broadcast_to(b_ref[...], acc_ref.shape)

    acc_ref[...] += lax.dot_general(
        x_ref[...], w_ref[...],
        dimension_numbers=(((1,), (1,)), ((), ())),
        preferred_element_type=jnp.float32,
    )

    @pl.when(k == pl.num_programs(2) - 1)
    def _():
        o_ref[...] = acc_ref[...].astype(o_ref.dtype)


@partial(jax.jit, static_argnames=("tm", "tn", "tk", "mxu_dtype", "use_pallas"))
def natural_affine_transform(x, weight, bias=None, *, tm=512, tn=512, tk=512,
                             mxu_dtype=jnp.bfloat16, use_pallas="auto"):
    """y = x @ weight.T + bias.

    x: [B, T, feat_dim], weight: [out_dim, feat_dim], bias: [1, out_dim] or None.
    mxu_dtype: dtype fed to the MXU (default bf16 operands, f32 accumulation).
      Pass None for exact matmul in the input dtype (matches the f32 PyTorch
      forward bit-for-bit up to accumulation order, but uses the slower
      multi-pass f32 MXU path).
    use_pallas: "auto" (XLA fallback for sub-tile problems), True, or False.
    """
    B, T, F_ = x.shape
    O, F2 = weight.shape
    assert F2 == F_, "weight feat_dim mismatch"
    M, K, N = B * T, F_, O
    out_dtype = x.dtype

    if use_pallas == "auto":
        # Sub-tile problems: a padded Pallas launch can't beat XLA's fused dot.
        use_pallas = (min(K, N) >= 128) and (M >= 64) and (M * K * N >= (1 << 22))

    if not use_pallas:
        y = jnp.einsum("btk,nk->btn", x, weight,
                       preferred_element_type=jnp.float32)
        if bias is not None:
            y = y + bias.reshape(1, 1, N).astype(jnp.float32)
        return y.astype(out_dtype)

    # ---- Pallas path -------------------------------------------------------
    in_dtype = mxu_dtype if mxu_dtype is not None else x.dtype
    in_itemsize = jnp.dtype(in_dtype).itemsize
    out_itemsize = jnp.dtype(out_dtype).itemsize
    # Sublane packing: bf16 packs 2 rows / sublane (align 16), int8/fp8 -> 32.
    align_m = {4: 8, 2: 16, 1: 32}.get(in_itemsize, 8)
    direct_acc = (out_dtype == jnp.float32)

    budget = 40 << 20  # resident-VMEM budget; safe for v7x's 64 MiB physical
    tm_cap, tn_cap, tk_cap = tm, tn, tk
    while True:
        tm_e, M_pad = _balanced_tile(M, tm_cap, align_m)
        tn_e, N_pad = _balanced_tile(N, tn_cap, 128)
        tk_e, K_pad = _min_pad_tile(K, tk_cap, 128)
        resident = (2 * (tm_e + tn_e) * tk_e * in_itemsize      # double-buffered inputs
                    + 2 * tm_e * tn_e * out_itemsize            # double-buffered output
                    + 2 * tn_e * 4                              # bias
                    + (0 if direct_acc else tm_e * tn_e * 4))   # f32 scratch accumulator
        if resident <= budget:
            break
        if tk_cap > 128:
            tk_cap //= 2
        elif tn_cap > 128:
            tn_cap //= 2
        elif tm_cap > align_m:
            tm_cap //= 2
        else:
            break

    # Keep >=2 blocks on a "parallel" grid axis so v7x's 2nd TensorCore isn't idle.
    if (M_pad // tm_e) * (N_pad // tn_e) == 1:
        if N_pad >= 2 * 128:
            tn_e = _round_up(_cdiv(N, 2), 128)
            N_pad = 2 * tn_e
        elif M_pad >= 2 * align_m:
            tm_e = _round_up(_cdiv(M, 2), align_m)
            M_pad = 2 * tm_e

    # One-time casts in the wrapper (bf16 operands are DMA'd from HBM as bf16).
    x2d = x.reshape(M, K)
    w2d = weight  # native (out_dim, feat_dim) layout; no host-side transpose
    if mxu_dtype is not None:
        if x2d.dtype != mxu_dtype:
            x2d = x2d.astype(mxu_dtype)
        if w2d.dtype != mxu_dtype:
            w2d = w2d.astype(mxu_dtype)

    if (M_pad, K_pad) != (M, K):
        x2d = jnp.pad(x2d, ((0, M_pad - M), (0, K_pad - K)))
    if (N_pad, K_pad) != (N, K):
        w2d = jnp.pad(w2d, ((0, N_pad - N), (0, K_pad - K)))

    if bias is None:
        b2d = jnp.zeros((1, N_pad), dtype=jnp.float32)
    else:
        b2d = bias.reshape(1, N).astype(jnp.float32)
        if N_pad != N:
            b2d = jnp.pad(b2d, ((0, 0), (0, N_pad - N)))

    grid = (M_pad // tm_e, N_pad // tn_e, K_pad // tk_e)

    in_specs = [
        pl.BlockSpec((tm_e, tk_e), lambda i, j, k: (i, k)),   # x tile (M, K)
        pl.BlockSpec((tn_e, tk_e), lambda i, j, k: (j, k)),   # weight tile (N, K)
        pl.BlockSpec((1, tn_e), lambda i, j, k: (0, j)),      # bias tile
    ]
    out_spec = pl.BlockSpec((tm_e, tn_e), lambda i, j, k: (i, j))

    vmem_limit = None
    if resident > (12 << 20):
        vmem_limit = min(60 << 20, _round_up(resident + (8 << 20), 1 << 20))
    cparams = pltpu.CompilerParams(
        dimension_semantics=("parallel", "parallel", "arbitrary"),
        vmem_limit_bytes=vmem_limit,
    )

    if direct_acc:
        out2d = pl.pallas_call(
            _affine_kernel_accum_out,
            out_shape=jax.ShapeDtypeStruct((M_pad, N_pad), jnp.float32),
            grid_spec=pltpu.PrefetchScalarGridSpec(
                num_scalar_prefetch=0, grid=grid,
                in_specs=in_specs, out_specs=out_spec),
            compiler_params=cparams,
        )(x2d, w2d, b2d)
    else:
        out2d = pl.pallas_call(
            _affine_kernel_scratch,
            out_shape=jax.ShapeDtypeStruct((M_pad, N_pad), out_dtype),
            grid_spec=pltpu.PrefetchScalarGridSpec(
                num_scalar_prefetch=0, grid=grid,
                in_specs=in_specs, out_specs=out_spec,
                scratch_shapes=[pltpu.VMEM((tm_e, tn_e), jnp.float32)]),
            compiler_params=cparams,
        )(x2d, w2d, b2d)

    if (M_pad, N_pad) != (M, N):
        out2d = out2d[:M, :N]
    return out2d.reshape(B, T, N).astype(out_dtype)


def init_natural_affine_params(key, feat_dim, out_dim, dtype=jnp.float32):
    """Replicates NaturalAffineTransform.init_parameters():
       weight ~ N(0,1) * 1/sqrt(feat_dim*out_dim);  bias ~ N(0,1)."""
    kw, kb = jax.random.split(key)
    weight = jax.random.normal(kw, (out_dim, feat_dim), dtype=dtype)
    weight = weight * (1.0 / math.sqrt(feat_dim * out_dim))
    bias = jax.random.normal(kb, (1, out_dim), dtype=dtype)
    return weight, bias


if __name__ == "__main__":
    # Small shapes consistent with the module: (batch, seq, feat_dim) input.
    batch, seq, feat_dim, out_dim = 2, 8, 32, 64

    key = jax.random.PRNGKey(0)
    kx, kp = jax.random.split(key)

    x = jax.random.normal(kx, (batch, seq, feat_dim), dtype=jnp.float32)
    weight, bias = init_natural_affine_params(kp, feat_dim, out_dim)

    # Reference: plain JAX affine (same semantics as F.linear).
    y_ref = x @ weight.T + bias

    # Exact-precision Pallas path (MXU fed f32; forced, since these shapes
    # would otherwise take the XLA small-problem fallback).
    y_f32 = natural_affine_transform(x, weight, bias, mxu_dtype=None,
                                     use_pallas=True)
    y_f32 = jax.block_until_ready(y_f32)
    assert y_f32.shape == (batch, seq, out_dim)
    assert jnp.allclose(y_f32, y_ref, atol=1e-5, rtol=1e-5)

    # Default fast path: bf16 operands from HBM, f32 accumulation (looser tol).
    y_bf16 = natural_affine_transform(x, weight, bias, use_pallas=True)
    y_bf16 = jax.block_until_ready(y_bf16)
    assert y_bf16.shape == (batch, seq, out_dim)
    assert jnp.allclose(y_bf16, y_ref, atol=2e-2, rtol=2e-2)

    # "auto" dispatch (these shapes take the XLA fallback) — sanity check.
    y_auto = jax.block_until_ready(natural_affine_transform(x, weight, bias))
    assert jnp.allclose(y_auto, y_ref, atol=2e-2, rtol=2e-2)

    print("KERNEL_OK")
</pallas_src>

<mosaic_0001>
module attributes {stable_mosaic.version = 11 : i64} {
  func.func @_affine_kernel_accum_out(%arg0: i32, %arg1: i32, %arg2: i32, %arg3: memref<8x128xf32, #tpu.memory_space<vmem>>, %arg4: memref<128x128xf32, #tpu.memory_space<vmem>>, %arg5: memref<1x128xf32, #tpu.memory_space<vmem>>, %arg6: memref<8x128xf32, #tpu.memory_space<vmem>>) attributes {dimension_semantics = [#tpu.dimension_semantics<parallel>, #tpu.dimension_semantics<parallel>, #tpu.dimension_semantics<arbitrary>], iteration_bounds = array<i64: 2, 1, 1>, scalar_prefetch = 0 : i64, scratch_operands = 0 : i64, tpu.core_type = #tpu.core_type<tc>, window_params = [{transform_indices = @transform_0, window_bounds = array<i64: 8, 128>}, {transform_indices = @transform_1, window_bounds = array<i64: 128, 128>}, {transform_indices = @transform_2, window_bounds = array<i64: 1, 128>}, {transform_indices = @transform_3, window_bounds = array<i64: 8, 128>}]} {
    %c0_i32 = arith.constant 0 : i32
    %0 = arith.cmpi eq, %arg2, %c0_i32 : i32
    %1 = arith.extui %0 : i1 to i32
    %c0_i32_0 = arith.constant 0 : i32
    %2 = arith.cmpi ne, %1, %c0_i32_0 : i32
    scf.if %2 {
      %c0_8 = arith.constant 0 : index
      %c0_9 = arith.constant 0 : index
      %9 = vector.load %arg5[%c0_8, %c0_9] : memref<1x128xf32, #tpu.memory_space<vmem>>, vector<1x128xf32>
      %10 = vector.shape_cast %9 : vector<1x128xf32> to vector<1x128xf32>
      %11 = vector.broadcast %10 : vector<1x128xf32> to vector<8x128xf32>
      %c0_10 = arith.constant 0 : index
      %c0_11 = arith.constant 0 : index
      %12 = vector.load %arg6[%c0_10, %c0_11] : memref<8x128xf32, #tpu.memory_space<vmem>>, vector<8x128xf32>
      tpu.vector_store %arg6[%c0_10, %c0_11], %11 {strides = array<i32>} : memref<8x128xf32, #tpu.memory_space<vmem>>, vector<8x128xf32>,
    } else {
    }
    %c0 = arith.constant 0 : index
    %c0_1 = arith.constant 0 : index
    %3 = vector.load %arg6[%c0, %c0_1] : memref<8x128xf32, #tpu.memory_space<vmem>>, vector<8x128xf32>
    %c0_2 = arith.constant 0 : index
    %c0_3 = arith.constant 0 : index
    %4 = vector.load %arg3[%c0_2, %c0_3] : memref<8x128xf32, #tpu.memory_space<vmem>>, vector<8x128xf32>
    %c0_4 = arith.constant 0 : index
    %c0_5 = arith.constant 0 : index
    %5 = vector.load %arg4[%c0_4, %c0_5] : memref<128x128xf32, #tpu.memory_space<vmem>>, vector<128x128xf32>
    %cst = arith.constant dense<0.000000e+00> : vector<8x128xf32>
    %6 = tpu.matmul %4, %5, %cst {dimension_numbers = #tpu.dot_dimension_numbers<[1], [1], [0], [0], [0, 0, 1, 0], [], []>} : vector<8x128xf32>, vector<128x128xf32>, vector<8x128xf32> -> vector<8x128xf32>
    %7 = arith.addf %3, %6 : vector<8x128xf32>
    %c0_6 = arith.constant 0 : index
    %c0_7 = arith.constant 0 : index
    %8 = vector.load %arg6[%c0_6, %c0_7] : memref<8x128xf32, #tpu.memory_space<vmem>>, vector<8x128xf32>
    tpu.vector_store %arg6[%c0_6, %c0_7], %7 {strides = array<i32>} : memref<8x128xf32, #tpu.memory_space<vmem>>, vector<8x128xf32>,
    return
  }
  func.func @transform_0(%arg0: i32, %arg1: i32, %arg2: i32) -> (i32, i32) {
    %c0_i32 = arith.constant 0 : i32
    return %arg0, %arg2 : i32, i32
  }
  func.func @transform_1(%arg0: i32, %arg1: i32, %arg2: i32) -> (i32, i32) {
    %c0_i32 = arith.constant 0 : i32
    return %arg1, %arg2 : i32, i32
  }
  func.func @transform_2(%arg0: i32, %arg1: i32, %arg2: i32) -> (i32, i32) {
    %c0_i32 = arith.constant 0 : i32
    %c0_i32_0 = arith.constant 0 : i32
    return %c0_i32, %arg1 : i32, i32
  }
  func.func @transform_3(%arg0: i32, %arg1: i32, %arg2: i32) -> (i32, i32) {
    %c0_i32 = arith.constant 0 : i32
    return %arg0, %arg1 : i32, i32
  }
}

</mosaic_0001>

<bundles_post_ra>
// kernel: natural_affine_transform.1
= control target key start
LH: loop header
LB: loop body
LE: loop exit
PB: predicated region body
PF: predicated region fallthrough
CT: control target
= control target key end

     0   :  { %s597_s12 = smov 0   ;;  %s599_s13 = smov 0   ;;  %s685_s0 = inlined_call_operand.vmem [shape: f32[16,128], index: 0, kind: input, shape index: {}]   ;;  %s686_s1 = inlined_call_operand.vmem [shape: f32[128,128], index: 1, kind: input, shape index: {}]   ;;  %s687_s2 = inlined_call_operand.vmem [shape: f32[1,128], index: 2, kind: input, shape index: {}]   ;;  %s688_s3 = inlined_call_operand.vmem [shape: f32[16,128], index: 3, kind: output, shape index: {}]  }
   0x1   :  { %s601_s14 = smov 0  }
   0x2 LB: > { %s32_s15 = sadd.s32 1, %s569_s13  ;;  %p467_p0 = scmp.ge.s32.totalorder %s573_s14, 1  ;;  %s573_s14 = sphi %s601_s14, %s13_s14   ;;  %s569_s13 = sphi %s599_s13, %s690_s13   ;;  %s565_s12 = sphi %s597_s12, %s689_s12  }
   0x3   : > { %p34_p1 = scmp.ge.s32.totalorder %s32_s15, 2  ;;  %p186_p2 = scmp.lt.s32.totalorder %s573_s14, 3 }
   0x5   : > { %s692_s15 = smov (%p34_p1, %s32_s15), 0  ;;  %p187_p3 = pnand %p467_p0, %p186_p2 }
   0x6   : > { %p225_p4 = scmp.lt.s32.totalorder (!%p187_p3), %s565_s12, 1 }
   0x7   : > { %190 = sbr.rel (%p187_p3) target bundleno = 273 (0x111), region = 32 }
   0xc   : > { %v280_v0 = vld [vmem:[%s686_s1 + $0x78] sm:$0xff]  ;;  %v575_v1 = vmov 0.0   ;;  %vm576_vm0 = vmmov 0   ;;  %v279_v2 = vld [vmem:[%s686_s1 + $0x70] sm:$0xff]  ;;  %v278_v3 = vld [vmem:[%s686_s1 + $0x68] sm:$0xff]  ;;  %s694_s12 = smov (!%p225_p4, %s565_s12), 1 }
   0xd   : > { %490 = vmatprep.subr.mxu0 %v575_v1  ;;  %522 = vmatprep.mubr.msk.f32.mxu0 %vm576_vm0, %v575_v1  ;;  %v277_v4 = vld [vmem:[%s686_s1 + $0x60] sm:$0xff]  ;;  %v276_v5 = vld [vmem:[%s686_s1 + $0x58] sm:$0xff]  ;;  %v275_v6 = vld [vmem:[%s686_s1 + $0x50] sm:$0xff]  ;;  %s468_s23 = sshll.u32 %s694_s12, 3 }
   0xe   : > { %491 = vmatpush3.xpose.msra.mxu0 %v280_v0  ;;  %v274_v7 = vld [vmem:[%s686_s1 + $0x48] sm:$0xff]  ;;  %v273_v8 = vld [vmem:[%s686_s1 + $0x40] sm:$0xff]  ;;  %v272_v9 = vld [vmem:[%s686_s1 + $0x38] sm:$0xff]  ;;  %s231_s28 = scalar_lea.vmem %s685_s0, %s468_s23  ;;  %s250_s12 = scalar_lea.vmem %s688_s3, %s468_s23 }
   0xf   : > { %492 = vmatprep.subr.mxu0 %v575_v1  ;;  %v271_v10 = vld [vmem:[%s686_s1 + $0x30] sm:$0xff]  ;;  %v270_v11 = vld [vmem:[%s686_s1 + $0x28] sm:$0xff]  ;;  %v269_v12 = vld [vmem:[%s686_s1 + $0x20] sm:$0xff] }
  0x10   : > { %v268_v13 = vld [vmem:[%s686_s1 + $0x18] sm:$0xff]  ;;  %v267_v14 = vld [vmem:[%s686_s1 + $0x10] sm:$0xff]  ;;  %v266_v15 = vld [vmem:[%s686_s1 + $0x8] sm:$0xff] }
  0x11   : > { %v265_v16 = vld [vmem:[%s686_s1] sm:$0xff] }
  0x12   : > { %493 = vmatpush3.xpose.msra.mxu0 %v279_v2  ;;  %v264_v17 = vld [vmem:[%s231_s28] sm:$0xff] }
  0x13   : > { %494 = vmatprep.subr.mxu0 %v575_v1  ;;  %v470_v18 = vld [vmem:[%s687_s2] ss:$0 sm:$0xff] }
  0x16   : > { %495 = vmatpush3.xpose.msra.mxu0 %v278_v3 }
  0x17   : > { %496 = vmatprep.subr.mxu0 %v575_v1 }
  0x1a   : > { %497 = vmatpush3.xpose.msra.mxu0 %v277_v4 }
  0x1b   : > { %498 = vmatprep.subr.mxu0 %v575_v1 }
  0x1e   : > { %499 = vmatpush3.xpose.msra.mxu0 %v276_v5 }
  0x1f   : > { %500 = vmatprep.subr.mxu0 %v575_v1 }
  0x22   : > { %501 = vmatpush3.xpose.msra.mxu0 %v275_v6 }
  0x23   : > { %502 = vmatprep.subr.mxu0 %v575_v1 }
  0x26   : > { %503 = vmatpush3.xpose.msra.mxu0 %v274_v7 }
  0x27   : > { %504 = vmatprep.subr.mxu0 %v575_v1 }
  0x2a   : > { %505 = vmatpush3.xpose.msra.mxu0 %v273_v8 }
  0x2b   : > { %506 = vmatprep.subr.mxu0 %v575_v1 }
  0x2e   : > { %507 = vmatpush3.xpose.msra.mxu0 %v272_v9 }
  0x2f   : > { %508 = vmatprep.subr.mxu0 %v575_v1 }
  0x32   : > { %509 = vmatpush3.xpose.msra.mxu0 %v271_v10 }
  0x33   : > { %510 = vmatprep.subr.mxu0 %v575_v1 }
  0x36   : > { %511 = vmatpush3.xpose.msra.mxu0 %v270_v11 }
  0x37   : > { %512 = vmatprep.subr.mxu0 %v575_v1 }
  0x3a   : > { %513 = vmatpush3.xpose.msra.mxu0 %v269_v12 }
  0x3b   : > { %514 = vmatprep.subr.mxu0 %v575_v1 }
  0x3e   : > { %515 = vmatpush3.xpose.msra.mxu0 %v268_v13 }
  0x3f   : > { %516 = vmatprep.subr.mxu0 %v575_v1 }
  0x42   : > { %517 = vmatpush3.xpose.msra.mxu0 %v267_v14 }
  0x43   : > { %518 = vmatprep.subr.mxu0 %v575_v1 }
  0x46   : > { %519 = vmatpush3.xpose.msra.mxu0 %v266_v15 }
  0x47   : > { %520 = vmatprep.subr.mxu0 %v575_v1 }
  0x4a   : > { %521 = vmatpush3.xpose.msra.mxu0 %v265_v16 }
  0x4d   : > { %523 = vmatmul.mubr.f32.vlgmr.msra.gmra.mxu0 %v264_v17 }
 0x10d   : > { %v347_v19 = vpop.f32.mrf.mxu0 }
 0x10e   : > { %v351_v20 = vadd.f32 %v470_v18, %v347_v19 }
 0x10f   : > { %v524_v21 = vpop.f32.mrf.mxu0 }
 0x110   : > { %352 = vst [vmem:[%s250_s12] sm:$0xff] %v351_v20 }
 0x111 PF: > { %s13_s14 = sadd.s32 1, %s573_s14   ;;  %s689_s12 = smov %s569_s13 }
 0x112   : > { %p10_p5 = scmp.ge.s32.totalorder %s13_s14, 4   ;;  %s690_s13 = smov %s692_s15 }
 0x114   :  { %12 = sbr.rel (!%p10_p5) target bundleno = 2 (0x2), region = 72 }

</bundles_post_ra>
